<compile_context>
chip_gen: v5e
topology: v5e:2x2
jax: 0.10.0
libtpu: 0.0.40
codegen_flags: <defaults>
</compile_context>

<pallas_src>
import functools

import jax
import jax.numpy as jnp
from jax import lax
from jax.experimental import pallas as pl
from jax.experimental.pallas import tpu as pltpu


_LANE = 128
_FEATURE_TILE_BYTES = 16 << 20   # budget for the double-buffered streamed tile
_MAX_TK = 8192                   # keep per-step DMA bursts reasonable


# --------------------------------------------------------------------------
# Kernels
# --------------------------------------------------------------------------
def _accumulate_gram(feat_ref, acc_ref, *, cd, tk, use_bf16):
    """acc += F_tile @ F_tile.T (NT-form dot_general, no transposed copy)."""
    k = pl.program_id(0)
    f = feat_ref[...]
    rem = cd % tk
    if rem != 0:  # static: last K tile is ragged -> zero its OOB columns
        limit = jnp.where(k == pl.num_programs(0) - 1, rem, tk)
        col = lax.broadcasted_iota(jnp.int32, f.shape, 1)
        f = jnp.where(col < limit, f, jnp.zeros_like(f))
    if use_bf16:
        f = f.astype(jnp.bfloat16)
    acc_ref[...] += lax.dot_general(
        f, f,
        dimension_numbers=(((1,), (1,)), ((), ())),
        preferred_element_type=jnp.float32,
    )


def _gram_kernel(feat_ref, g_ref, acc_ref, *, cd, tk, inv_denom, use_bf16):
    """Accumulate G = F @ F.T over K tiles; finalize with 1/denom scale."""
    k = pl.program_id(0)

    @pl.when(k == 0)
    def _():
        acc_ref[...] = jnp.zeros_like(acc_ref)

    _accumulate_gram(feat_ref, acc_ref, cd=cd, tk=tk, use_bf16=use_bf16)

    @pl.when(k == pl.num_programs(0) - 1)
    def _():
        g_ref[...] = acc_ref[...] * inv_denom


def _style_loss_kernel(feat_ref, tgt_ref, loss_ref, acc_ref, *,
                       cd, tk, inv_denom, inv_n, use_bf16):
    """K-tiled Gram accumulation fused with MSE against the resident target."""
    k = pl.program_id(0)

    @pl.when(k == 0)
    def _():
        acc_ref[...] = jnp.zeros_like(acc_ref)

    _accumulate_gram(feat_ref, acc_ref, cd=cd, tk=tk, use_bf16=use_bf16)

    # Scale, subtract target and reduce only once, in the last K step.
    # No padding mask needed: Gram and target share the exact (ab, ab) shape.
    @pl.when(k == pl.num_programs(0) - 1)
    def _():
        diff = acc_ref[...] * inv_denom - tgt_ref[...]
        loss_ref[0, 0] = jnp.sum(diff * diff) * inv_n


# --------------------------------------------------------------------------
# Wrappers
# --------------------------------------------------------------------------
def _prep_features(x_nchw):
    """NCHW -> (AB, CD) feature view (no HBM copy, no padding)."""
    a, b, c, d = x_nchw.shape
    ab, cd = a * b, c * d
    feats = x_nchw.reshape(ab, cd)
    return feats, ab, cd, float(a * b * c * d)


def _choose_tk(ab, cd, itemsize):
    """Pick the K tile: largest lane-aligned tile within the VMEM budget."""
    tk = _FEATURE_TILE_BYTES // (2 * max(ab, 1) * itemsize)
    tk = max(_LANE, (tk // _LANE) * _LANE)
    tk = min(tk, _MAX_TK)
    if cd <= tk:
        return cd, 1  # single full-width block; no ragged masking needed
    return tk, -(-cd // tk)  # cdiv


def _compiler_params(ab, tk, grid_k, itemsize):
    feat_bufs = (2 if grid_k > 1 else 1) * ab * tk * itemsize
    resident = 3 * ab * ab * 4  # f32 accumulator scratch + resident block(s)
    need = feat_bufs + resident
    try:
        cap = pltpu.get_tpu_info().vmem_capacity_bytes
    except Exception:  # conservative fallback (v7x physical VMEM)
        cap = 64 << 20
    limit = min(need + (16 << 20), cap * 7 // 8)
    limit = max(limit, 32 << 20)
    return pltpu.CompilerParams(
        dimension_semantics=("arbitrary",),  # K axis is a reduction
        vmem_limit_bytes=int(limit),
    )


def _gram_pallas(feats, ab, cd, denom, use_bf16):
    """Gram matrix G = (F @ F.T) / denom, shape (ab, ab), float32."""
    itemsize = feats.dtype.itemsize
    tk, grid_k = _choose_tk(ab, cd, itemsize)
    kernel = functools.partial(
        _gram_kernel, cd=cd, tk=tk, inv_denom=1.0 / denom, use_bf16=use_bf16)
    return pl.pallas_call(
        kernel,
        out_shape=jax.ShapeDtypeStruct((ab, ab), jnp.float32),
        grid_spec=pltpu.PrefetchScalarGridSpec(
            num_scalar_prefetch=0,
            grid=(grid_k,),
            in_specs=[pl.BlockSpec((ab, tk), lambda k: (0, k))],
            out_specs=pl.BlockSpec((ab, ab), lambda k: (0, 0)),
            scratch_shapes=[pltpu.VMEM((ab, ab), jnp.float32)],
        ),
        compiler_params=_compiler_params(ab, tk, grid_k, itemsize),
        cost_estimate=pl.CostEstimate(
            flops=2 * ab * ab * cd,
            transcendentals=0,
            bytes_accessed=ab * cd * itemsize + ab * ab * 4,
        ),
    )(feats)


def _style_loss_pallas(feats, target, ab, cd, denom, use_bf16):
    """Scalar MSE between the Gram of `feats` and the target Gram."""
    itemsize = feats.dtype.itemsize
    tk, grid_k = _choose_tk(ab, cd, itemsize)
    kernel = functools.partial(
        _style_loss_kernel, cd=cd, tk=tk,
        inv_denom=1.0 / denom, inv_n=1.0 / float(ab * ab), use_bf16=use_bf16)
    loss = pl.pallas_call(
        kernel,
        out_shape=jax.ShapeDtypeStruct((1, 1), jnp.float32),
        grid_spec=pltpu.PrefetchScalarGridSpec(
            num_scalar_prefetch=0,
            grid=(grid_k,),
            in_specs=[
                pl.BlockSpec((ab, tk), lambda k: (0, k)),   # streamed K tiles
                pl.BlockSpec((ab, ab), lambda k: (0, 0)),   # resident target
            ],
            out_specs=pl.BlockSpec(memory_space=pltpu.MemorySpace.SMEM),
            scratch_shapes=[pltpu.VMEM((ab, ab), jnp.float32)],
        ),
        compiler_params=_compiler_params(ab, tk, grid_k, itemsize),
        cost_estimate=pl.CostEstimate(
            flops=2 * ab * ab * cd,
            transcendentals=0,
            bytes_accessed=ab * cd * itemsize + ab * ab * 4 + 4,
        ),
    )(feats, target)
    return loss[0, 0]


class StyleLoss:
    """JAX/Pallas port of the PyTorch StyleLoss module (forward pass)."""

    def __init__(self, target_feature, use_bf16_matmul=False):
        feats, ab, cd, denom = _prep_features(target_feature)
        self._use_bf16 = use_bf16_matmul
        self._ab = ab
        # Detached target Gram matrix, shape (a*b, a*b), float32.
        self.target = _gram_pallas(feats, ab, cd, denom, use_bf16_matmul)
        self.loss = None

    def forward(self, x):
        feats, ab, cd, denom = _prep_features(x)
        # mse_loss requires matching Gram shapes (same as the PyTorch module).
        assert ab == self._ab, (
            f"input a*b={ab} must match target a*b={self._ab}")
        self.loss = _style_loss_pallas(
            feats, self.target, ab, cd, denom, self._use_bf16)
        return x  # module passes its input through unchanged

    __call__ = forward


if __name__ == "__main__":
    key = jax.random.PRNGKey(0)
    k1, k2 = jax.random.split(key)
    # Small shapes: batch=2, channels=4, spatial=16x16 -> features (8, 256)
    target_feature = jax.random.normal(k1, (2, 4, 16, 16), dtype=jnp.float32)
    x = jax.random.normal(k2, (2, 4, 16, 16), dtype=jnp.float32)

    module = StyleLoss(target_feature)
    out = module(x)

    jax.block_until_ready(out)
    jax.block_until_ready(module.loss)
    jax.block_until_ready(module.target)

    # Sanity check against a pure-JAX reference.
    def ref_gram(t):
        a, b, c, d = t.shape
        f = t.reshape(a * b, c * d).astype(jnp.float32)
        return (f @ f.T) / (a * b * c * d)

    ref_loss = jnp.mean((ref_gram(x) - ref_gram(target_feature)) ** 2)
    assert jnp.allclose(module.loss, ref_loss, rtol=1e-5, atol=1e-5), (
        module.loss, ref_loss)
    assert jnp.allclose(module.target, ref_gram(target_feature),
                        rtol=1e-5, atol=1e-5)
    assert out.shape == x.shape and out.dtype == x.dtype

    print("KERNEL_OK")
</pallas_src>

<mosaic_0001>
module attributes {stable_mosaic.version = 11 : i64} {
  func.func @_gram_kernel(%arg0: i32, %arg1: memref<8x256xf32, #tpu.memory_space<vmem>>, %arg2: memref<8x8xf32, #tpu.memory_space<vmem>>, %arg3: memref<8x8xf32, #tpu.memory_space<vmem>>) attributes {dimension_semantics = [#tpu.dimension_semantics<arbitrary>], iteration_bounds = array<i64: 1>, scalar_prefetch = 0 : i64, scratch_operands = 1 : i64, tpu.core_type = #tpu.core_type<tc>, window_params = [{transform_indices = @transform_0, window_bounds = array<i64: 8, 256>}, {pipeline_mode = #tpu.pipeline_mode<synchronous>, transform_indices = @transform_1, window_bounds = array<i64: 8, 8>}]} {
    %c0_i32 = arith.constant 0 : i32
    %0 = arith.cmpi eq, %arg0, %c0_i32 : i32
    %1 = arith.extui %0 : i1 to i32
    %c0_i32_0 = arith.constant 0 : i32
    %2 = arith.cmpi ne, %1, %c0_i32_0 : i32
    scf.if %2 {
      %cst_8 = arith.constant 0.000000e+00 : f32
      %11 = vector.broadcast %cst_8 : f32 to vector<8x8xf32>
      %c0_9 = arith.constant 0 : index
      %c0_10 = arith.constant 0 : index
      %12 = vector.load %arg3[%c0_9, %c0_10] : memref<8x8xf32, #tpu.memory_space<vmem>>, vector<8x8xf32>
      tpu.vector_store %arg3[%c0_9, %c0_10], %11 {strides = array<i32>} : memref<8x8xf32, #tpu.memory_space<vmem>>, vector<8x8xf32>,
    } else {
    }
    %c0 = arith.constant 0 : index
    %c0_1 = arith.constant 0 : index
    %3 = vector.load %arg1[%c0, %c0_1] : memref<8x256xf32, #tpu.memory_space<vmem>>, vector<8x256xf32>
    %c0_2 = arith.constant 0 : index
    %c0_3 = arith.constant 0 : index
    %4 = vector.load %arg3[%c0_2, %c0_3] : memref<8x8xf32, #tpu.memory_space<vmem>>, vector<8x8xf32>
    %cst = arith.constant dense<0.000000e+00> : vector<8x8xf32>
    %5 = tpu.matmul %3, %3, %cst {dimension_numbers = #tpu.dot_dimension_numbers<[1], [1], [0], [0], [0, 0, 1, 0], [], []>} : vector<8x256xf32>, vector<8x256xf32>, vector<8x8xf32> -> vector<8x8xf32>
    %6 = arith.addf %4, %5 : vector<8x8xf32>
    %c0_4 = arith.constant 0 : index
    %c0_5 = arith.constant 0 : index
    %7 = vector.load %arg3[%c0_4, %c0_5] : memref<8x8xf32, #tpu.memory_space<vmem>>, vector<8x8xf32>
    tpu.vector_store %arg3[%c0_4, %c0_5], %6 {strides = array<i32>} : memref<8x8xf32, #tpu.memory_space<vmem>>, vector<8x8xf32>,
    %c0_i32_6 = arith.constant 0 : i32
    %8 = arith.cmpi eq, %arg0, %c0_i32_6 : i32
    %9 = arith.extui %8 : i1 to i32
    %c0_i32_7 = arith.constant 0 : i32
    %10 = arith.cmpi ne, %9, %c0_i32_7 : i32
    scf.if %10 {
      %c0_8 = arith.constant 0 : index
      %c0_9 = arith.constant 0 : index
      %11 = vector.load %arg3[%c0_8, %c0_9] : memref<8x8xf32, #tpu.memory_space<vmem>>, vector<8x8xf32>
      %cst_10 = arith.constant 4.8828125E-4 : f32
      %12 = vector.broadcast %cst_10 : f32 to vector<8x8xf32>
      %13 = arith.mulf %11, %12 : vector<8x8xf32>
      %c0_11 = arith.constant 0 : index
      %c0_12 = arith.constant 0 : index
      %14 = vector.load %arg2[%c0_11, %c0_12] : memref<8x8xf32, #tpu.memory_space<vmem>>, vector<8x8xf32>
      tpu.vector_store %arg2[%c0_11, %c0_12], %13 {strides = array<i32>} : memref<8x8xf32, #tpu.memory_space<vmem>>, vector<8x8xf32>,
    } else {
    }
    return
  }
  func.func @transform_0(%arg0: i32) -> (i32, i32) {
    %c0_i32 = arith.constant 0 : i32
    %c0_i32_0 = arith.constant 0 : i32
    return %c0_i32, %arg0 : i32, i32
  }
  func.func @transform_1(%arg0: i32) -> (i32, i32) {
    %c0_i32 = arith.constant 0 : i32
    %c0_i32_0 = arith.constant 0 : i32
    %c0_i32_1 = arith.constant 0 : i32
    return %c0_i32, %c0_i32_0 : i32, i32
  }
}

</mosaic_0001>

<bundles_post_ra>
// kernel: tpu_custom_call.1
= control target key start
LH: loop header
LB: loop body
LE: loop exit
PB: predicated region body
PF: predicated region fallthrough
CT: control target
= control target key end

     0   :  { %6 = vsyncpa [#allocation4], 0  ;;  %s175_s0 = inlined_call_operand.hbm [shape: f32[8,256], index: 0, kind: input, shape index: {}]   ;;  %s176_s1 = inlined_call_operand.hbm [shape: f32[8,8], index: 1, kind: output, shape index: {}]  }
   0x1   :  { %7 = vsyncpa [#allocation5], 0  ;;  %s13_s8 = sshll.u32 %s175_s0, 4  ;;  %s153_s9 = smov [#allocation3]   ;;  %s14_s8 = int_to_ptr.hbm [resolvable:$true] %s13_s8 }
   0x2   :  { %s15_s10 = sshll.u32 %s153_s9, 4  ;;  %s16_s10 = int_to_ptr.vmem [resolvable:$true] %s15_s10 }
   0x3   :  { %18 = dma.hbm_to_vmem [thread:$0]  %s14_s8, 256, %s16_s10, [#allocation4]  }
   0x4   :  { %149 = dma.done.wait [#allocation4], 256  }
   0x5   :  { %150 = vsyncadd [#allocation4], 4294967040  ;;  %v29_v0 = vld [vmem:[#allocation3] sm:$0xff]  ;;  %v30_v1 = vld [vmem:[#allocation3 + $0x8] sm:$0xff]  ;;  %vm27_vm0 = vcmask 64512   ;;  %v154_v2 = vmov 0.0  }
   0x6   :  { %47 = vmatpush.xpose.msra.mxu0 %v29_v0  ;;  %67 = vmatpush.xpose.msra.mxu1 %v30_v1  ;;  %28 = vst.msk [vmem:[#allocation2] sm:$0xff] %vm27_vm0, %v154_v2  ;;  %s155_s0 = smov [#allocation6]   ;;  %s88_s14 = sshll.u32 %s176_s1, 4  ;;  %s89_s14 = int_to_ptr.hbm [resolvable:$true] %s88_s14 }
   0x7   :  { %s86_s11 = sshll.u32 %s155_s0, 4  ;;  %s87_s11 = int_to_ptr.vmem [resolvable:$true] %s86_s11 }
   0x9   :  { %48 = vmatmul.f32.vlgmr.msra.gmra.mxu0 %v29_v0  ;;  %68 = vmatmul.f32.vlgmr.msra.gmra.mxu1 %v30_v1 }
   0xd   :  { %v31_v4 = vld [vmem:[#allocation2] sm:$0xff] }
  0x86   :  { %v49_v3 = vpop.f32.mrf.mxu0  ;;  %v69_v5 = vpop.f32.mrf.mxu1 }
  0x87   :  { %v70_v6 = vadd.f32 %v69_v5, %v49_v3 }
  0x89   :  { %v72_v7 = vadd.f32 %v70_v6, %v31_v4 }
  0x8b   :  { %74 = vst.msk [vmem:[#allocation2] sm:$0xff] %vm27_vm0, %v72_v7 }
  0x92   :  { %v78_v8 = vld [vmem:[#allocation2] sm:$0xff] }
  0x93   :  { %v79_v9 = vmul.f32 0.00048828125, %v78_v8 }
  0x95   :  { %80 = vst.msk [vmem:[#allocation6] sm:$0xff] %vm27_vm0, %v79_v9 }
  0x96   :  { %91 = dma.vmem_to_hbm [thread:$0]  %s87_s11, 128, %s89_s14, [#allocation5]  }
  0x97   :  { %151 = dma.done.wait [#allocation5], 128  }
  0x98   :  { %152 = vsyncadd [#allocation5], 4294967168 }
  0x99   :  { %96 = vsyncpa [#allocation4], 1 }
  0x9a   :  { %97 = vsyncpa [#allocation5], 1 }

</bundles_post_ra>
